<compile_context>
chip_gen: v6e
topology: v6e:2x2x1
jax: 0.10.0
libtpu: 0.0.40
codegen_flags: <defaults>
</compile_context>

<pallas_src>
import functools
import math

import jax
import jax.numpy as jnp
from jax.experimental import pallas as pl
from jax.experimental.pallas import tpu as pltpu


def _rsnorm_kernel(x_ref, scale_ref, bias_ref, out_ref, psum_ref, *,
                   rows_total, block_rows):
    i = pl.program_id(0)

    x = x_ref[...].astype(jnp.float32)                       # (tm, lanes)
    out_ref[...] = (x * scale_ref[...] + bias_ref[...]).astype(out_ref.dtype)

    if rows_total % block_rows != 0:
        last = pl.num_programs(0) - 1

        # All full blocks: plain unmasked sum (no iota / select).
        @pl.when(i != last)
        def _():
            psum_ref[...] = jnp.sum(x, axis=0, keepdims=True)[None]

        # Ragged last block only: mask rows past rows_total out of the sum.
        # (Their normalized values are never written back — out-of-bounds
        # output rows are dropped on store.)
        @pl.when(i == last)
        def _():
            row_ids = i * block_rows + jax.lax.broadcasted_iota(
                jnp.int32, x.shape, 0)
            xm = jnp.where(row_ids < rows_total, x, 0.0)
            psum_ref[...] = jnp.sum(xm, axis=0, keepdims=True)[None]
    else:
        psum_ref[...] = jnp.sum(x, axis=0, keepdims=True)[None]


def _vmem_capacity_bytes():
    try:
        info = pltpu.get_tpu_info()
        cap = getattr(info, "vmem_capacity_bytes", None)
        if cap:
            return int(cap)
    except Exception:
        pass
    return 64 * 1024 * 1024  # conservative: v7x per-TC VMEM


def _sublane_multiple(dtype):
    # f32 -> 8, bf16 -> 16, int8/fp8 -> 32 (sub-32-bit dtypes pack sublanes).
    return max(8, 32 // jnp.dtype(dtype).itemsize)


def _choose_fold(n_rows, dim):
    """Fold consecutive rows into lanes so the minor dim is a multiple of 128
    (unmasked lane-dense stores).  Only fold when the row count permits an
    exact contiguous reshape."""
    if dim % 128 == 0:
        return 1
    base = math.lcm(dim, 128) // dim
    if base * dim > 1024 or n_rows % base != 0:
        return 1
    fold = base
    # widen lanes up to ~512 while the row count stays divisible
    while fold * dim < 512 and n_rows % (fold * 2) == 0:
        fold *= 2
    return fold


def _choose_row_tile(n_rows, lanes, in_itemsize, out_itemsize, sub_mult,
                     tile_budget_bytes):
    """Largest row tile (multiple of the sublane packing factor) such that the
    double-buffered input + output blocks fit the VMEM tile budget."""
    bytes_per_row = lanes * (in_itemsize + out_itemsize)
    tm = tile_budget_bytes // (2 * bytes_per_row)            # 2x double buffer
    tm = (tm // sub_mult) * sub_mult
    n_rounded = -(-n_rows // sub_mult) * sub_mult
    return int(max(sub_mult, min(tm, n_rounded)))


def rsnorm_forward(x, running_mean, running_variance, step, *, eps=1e-5,
                   training=True, tile_vmem_budget_bytes=None):
    """Pallas implementation of RSNorm.forward.

    x:                (..., dim)
    running_mean:     (dim,)
    running_variance: (dim,)
    step:             python int or scalar (the 'time' buffer, >= 1)

    Returns (normed, (new_step, new_mean, new_variance)).
    In eval mode the state is echoed unchanged.
    """
    dim = x.shape[-1]
    assert running_mean.shape == (dim,) and running_variance.shape == (dim,)

    lead_shape = x.shape[:-1]
    n = int(math.prod(lead_shape)) if lead_shape else 1

    # ---- lane-dense layout: fold rows into lanes when dim is not /128 ----
    fold = _choose_fold(n, dim)
    lanes = dim * fold
    n_rows = n // fold
    x2 = x.reshape(n_rows, lanes)             # contiguous reshape: no HBM copy

    # ---- hoisted (1, lanes) prep: scale/bias computed once, kept in f32 ----
    var_f32 = running_variance.astype(jnp.float32)
    mean_f32 = running_mean.astype(jnp.float32)
    inv_std = jax.lax.rsqrt(jnp.maximum(var_f32, jnp.float32(eps)))
    scale = inv_std
    bias = -mean_f32 * inv_std
    if fold > 1:
        scale = jnp.tile(scale, fold)
        bias = jnp.tile(bias, fold)
    scale = scale.reshape(1, lanes)
    bias = bias.reshape(1, lanes)

    # ---- tiling (VMEM-capacity aware) ----
    capacity = _vmem_capacity_bytes()
    default_budget = int(0.4 * capacity)
    if tile_vmem_budget_bytes is None:
        tile_budget = default_budget
    else:
        tile_budget = min(int(tile_vmem_budget_bytes), default_budget)
    tile_budget = max(tile_budget, 1 << 16)

    itemsize = jnp.dtype(x.dtype).itemsize
    sub_mult = _sublane_multiple(x.dtype)
    tm = _choose_row_tile(n_rows, lanes, itemsize, itemsize, sub_mult,
                          tile_budget)
    num_blocks = pl.cdiv(n_rows, tm)

    vmem_limit = int(min(capacity - 8 * 1024 * 1024,
                         tile_budget + 16 * 1024 * 1024))

    kernel = functools.partial(_rsnorm_kernel, rows_total=n_rows,
                               block_rows=tm)

    normed_flat, psum = pl.pallas_call(
        kernel,
        out_shape=(
            jax.ShapeDtypeStruct((n_rows, lanes), x.dtype),
            jax.ShapeDtypeStruct((num_blocks, 1, lanes), jnp.float32),
        ),
        grid_spec=pltpu.PrefetchScalarGridSpec(
            num_scalar_prefetch=0,
            grid=(num_blocks,),
            in_specs=[
                pl.BlockSpec((tm, lanes), lambda i: (i, 0)),
                pl.BlockSpec((1, lanes), lambda i: (0, 0)),
                pl.BlockSpec((1, lanes), lambda i: (0, 0)),
            ],
            out_specs=[
                pl.BlockSpec((tm, lanes), lambda i: (i, 0)),
                # one partial sum per row block -> row axis stays "parallel"
                pl.BlockSpec((1, 1, lanes), lambda i: (i, 0, 0)),
            ],
        ),
        compiler_params=pltpu.CompilerParams(
            dimension_semantics=("parallel",),
            vmem_limit_bytes=vmem_limit,
        ),
    )(x2, scale, bias)

    normed = normed_flat.reshape(x.shape)

    if not training:
        return normed, (step, running_mean, running_variance)

    # ---- running-statistics update (matches the torch.no_grad block) ----
    lane_sum = jnp.sum(psum, axis=(0, 1))                     # (lanes,)
    feat_sum = (lane_sum.reshape(fold, dim).sum(axis=0)
                if fold > 1 else lane_sum)                    # (dim,)
    # step is initialized to 1 in the module, so division by `time` is safe.
    time = jnp.asarray(step, jnp.float32)
    new_obs_mean = feat_sum / jnp.float32(n)   # reduce(x, '... d -> d', 'mean')
    # TODO(synk): maybe_distributed_mean (cross-host all-reduce) not applicable single-device
    delta = new_obs_mean - mean_f32
    new_mean = mean_f32 + delta / time
    new_variance = (time - 1.0) / time * (var_f32 + delta ** 2 / time)
    new_step = step + 1
    return normed, (new_step, new_mean, new_variance)


if __name__ == "__main__":
    key = jax.random.PRNGKey(0)
    dim = 32
    eps = 1e-5
    step = 1

    running_mean = jnp.zeros((dim,), jnp.float32)
    running_variance = jnp.ones((dim,), jnp.float32)

    def reference(x, mean, var, step):
        xf = x.astype(jnp.float32)
        d = x.shape[-1]
        normed = (xf - mean) * jax.lax.rsqrt(jnp.maximum(var, eps))
        obs_mean = xf.reshape(-1, d).mean(axis=0)
        delta = obs_mean - mean
        new_mean = mean + delta / step
        new_var = (step - 1) / step * (var + delta ** 2 / step)
        return normed, new_mean, new_var

    k1, k2, k3, k4 = jax.random.split(key, 4)

    # Case 1: batch=2, seq=8, dim=32 — folded lanes, single (ragged) block.
    x1 = jax.random.normal(k1, (2, 8, dim), dtype=jnp.float32) * 2.0 + 0.5
    normed1, (s1, m1, v1) = rsnorm_forward(
        x1, running_mean, running_variance, step, eps=eps, training=True)
    jax.block_until_ready((normed1, m1, v1))
    rn1, rm1, rv1 = reference(x1, running_mean, running_variance, step)
    assert jnp.allclose(normed1, rn1, atol=1e-5, rtol=1e-5)
    assert jnp.allclose(m1, rm1, atol=1e-5, rtol=1e-5)
    assert jnp.allclose(v1, rv1, atol=1e-5, rtol=1e-5)
    assert int(s1) == step + 1

    # Case 2: ragged row count (n=15) — unfolded path + last-block mask.
    x2 = jax.random.normal(k2, (3, 5, dim), dtype=jnp.float32) - 1.0
    normed2, (s2, m2, v2) = rsnorm_forward(
        x2, running_mean, running_variance, step, eps=eps, training=True)
    jax.block_until_ready((normed2, m2, v2))
    rn2, rm2, rv2 = reference(x2, running_mean, running_variance, step)
    assert jnp.allclose(normed2, rn2, atol=1e-5, rtol=1e-5)
    assert jnp.allclose(m2, rm2, atol=1e-5, rtol=1e-5)
    assert jnp.allclose(v2, rv2, atol=1e-5, rtol=1e-5)
    assert int(s2) == step + 1

    # Case 3: n=256 with a tiny VMEM budget — multiple row blocks, exercises
    # the per-block partial-sum outputs and the wrapper reduction.
    x3 = jax.random.normal(k3, (8, 32, dim), dtype=jnp.float32) * 0.7 + 2.0
    normed3, (s3, m3, v3) = rsnorm_forward(
        x3, running_mean, running_variance, step, eps=eps, training=True,
        tile_vmem_budget_bytes=64 * 1024)
    jax.block_until_ready((normed3, m3, v3))
    rn3, rm3, rv3 = reference(x3, running_mean, running_variance, step)
    assert jnp.allclose(normed3, rn3, atol=1e-5, rtol=1e-5)
    assert jnp.allclose(m3, rm3, atol=1e-5, rtol=1e-5)
    assert jnp.allclose(v3, rv3, atol=1e-5, rtol=1e-5)
    assert int(s3) == step + 1

    # Case 4: bf16 input, dim=256 (already lane-dense, no fold), f32 params.
    dim4 = 256
    rm4_run = jnp.zeros((dim4,), jnp.float32)
    rv4_run = jnp.ones((dim4,), jnp.float32)
    x4 = jax.random.normal(k4, (2, 16, dim4), dtype=jnp.bfloat16)
    normed4, (s4, m4, v4) = rsnorm_forward(
        x4, rm4_run, rv4_run, step, eps=eps, training=True)
    jax.block_until_ready((normed4, m4, v4))
    rn4, rm4, rv4 = reference(x4, rm4_run, rv4_run, step)
    assert jnp.allclose(normed4.astype(jnp.float32), rn4, atol=5e-2, rtol=2e-2)
    assert jnp.allclose(m4, rm4, atol=1e-3, rtol=1e-3)
    assert jnp.allclose(v4, rv4, atol=1e-3, rtol=1e-3)
    assert int(s4) == step + 1

    print("KERNEL_OK")
</pallas_src>

<mosaic_0001>
module attributes {stable_mosaic.version = 11 : i64} {
  func.func @_rsnorm_kernel(%arg0: i32, %arg1: memref<8x512xf32, #tpu.memory_space<vmem>>, %arg2: memref<1x512xf32, #tpu.memory_space<vmem>>, %arg3: memref<1x512xf32, #tpu.memory_space<vmem>>, %arg4: memref<8x512xf32, #tpu.memory_space<vmem>>, %arg5: memref<1x1x512xf32, #tpu.memory_space<vmem>>) attributes {dimension_semantics = [#tpu.dimension_semantics<parallel>], iteration_bounds = array<i64: 1>, scalar_prefetch = 0 : i64, scratch_operands = 0 : i64, tpu.core_type = #tpu.core_type<tc>, window_params = [{transform_indices = @transform_0, window_bounds = array<i64: 8, 512>}, {pipeline_mode = #tpu.pipeline_mode<synchronous>, transform_indices = @transform_1, window_bounds = array<i64: 1, 512>}, {pipeline_mode = #tpu.pipeline_mode<synchronous>, transform_indices = @transform_2, window_bounds = array<i64: 1, 512>}, {transform_indices = @transform_3, window_bounds = array<i64: 8, 512>}, {transform_indices = @transform_4, window_bounds = array<i64: 1, 1, 512>}]} {
    %c0 = arith.constant 0 : index
    %c0_0 = arith.constant 0 : index
    %0 = vector.load %arg1[%c0, %c0_0] : memref<8x512xf32, #tpu.memory_space<vmem>>, vector<8x512xf32>
    %c0_1 = arith.constant 0 : index
    %c0_2 = arith.constant 0 : index
    %1 = vector.load %arg2[%c0_1, %c0_2] : memref<1x512xf32, #tpu.memory_space<vmem>>, vector<1x512xf32>
    %2 = vector.broadcast %1 : vector<1x512xf32> to vector<8x512xf32>
    %3 = arith.mulf %0, %2 : vector<8x512xf32>
    %c0_3 = arith.constant 0 : index
    %c0_4 = arith.constant 0 : index
    %4 = vector.load %arg3[%c0_3, %c0_4] : memref<1x512xf32, #tpu.memory_space<vmem>>, vector<1x512xf32>
    %5 = vector.broadcast %4 : vector<1x512xf32> to vector<8x512xf32>
    %6 = arith.addf %3, %5 : vector<8x512xf32>
    %c0_5 = arith.constant 0 : index
    %c0_6 = arith.constant 0 : index
    %7 = vector.load %arg4[%c0_5, %c0_6] : memref<8x512xf32, #tpu.memory_space<vmem>>, vector<8x512xf32>
    tpu.vector_store %arg4[%c0_5, %c0_6], %6 {strides = array<i32>} : memref<8x512xf32, #tpu.memory_space<vmem>>, vector<8x512xf32>,
    %c0_i32 = arith.constant 0 : i32
    %8 = arith.cmpi ne, %arg0, %c0_i32 : i32
    %9 = arith.extui %8 : i1 to i32
    %c0_i32_7 = arith.constant 0 : i32
    %10 = arith.cmpi ne, %9, %c0_i32_7 : i32
    scf.if %10 {
      %cst = arith.constant dense<0.000000e+00> : vector<512xf32>
      %14 = vector.multi_reduction <add>, %0, %cst [0] : vector<8x512xf32> to vector<512xf32>
      %15 = vector.shape_cast %14 : vector<512xf32> to vector<1x512xf32>
      %16 = vector.shape_cast %15 : vector<1x512xf32> to vector<1x1x512xf32>
      %c0_10 = arith.constant 0 : index
      %c0_11 = arith.constant 0 : index
      %c0_12 = arith.constant 0 : index
      %17 = vector.load %arg5[%c0_10, %c0_11, %c0_12] : memref<1x1x512xf32, #tpu.memory_space<vmem>>, vector<1x1x512xf32>
      tpu.vector_store %arg5[%c0_10, %c0_11, %c0_12], %16 {strides = array<i32>} : memref<1x1x512xf32, #tpu.memory_space<vmem>>, vector<1x1x512xf32>,
    } else {
    }
    %c0_i32_8 = arith.constant 0 : i32
    %11 = arith.cmpi eq, %arg0, %c0_i32_8 : i32
    %12 = arith.extui %11 : i1 to i32
    %c0_i32_9 = arith.constant 0 : i32
    %13 = arith.cmpi ne, %12, %c0_i32_9 : i32
    scf.if %13 {
      %c8_i32 = arith.constant 8 : i32
      %14 = arith.muli %arg0, %c8_i32 : i32
      %15 = tpu.iota {dimensions = array<i32: 0>} : vector<8x512xi32>
      %16 = vector.broadcast %14 : i32 to vector<8x512xi32>
      %17 = arith.addi %16, %15 : vector<8x512xi32>
      %c1_i32 = arith.constant 1 : i32
      %18 = vector.broadcast %c1_i32 : i32 to vector<8x512xi32>
      %19 = arith.cmpi slt, %17, %18 : vector<8x512xi32>
      %cst = arith.constant 0.000000e+00 : f32
      %20 = vector.broadcast %cst : f32 to vector<8x512xf32>
      %21 = arith.select %19, %0, %20 : vector<8x512xi1>, vector<8x512xf32>
      %cst_10 = arith.constant dense<0.000000e+00> : vector<512xf32>
      %22 = vector.multi_reduction <add>, %21, %cst_10 [0] : vector<8x512xf32> to vector<512xf32>
      %23 = vector.shape_cast %22 : vector<512xf32> to vector<1x512xf32>
      %24 = vector.shape_cast %23 : vector<1x512xf32> to vector<1x1x512xf32>
      %c0_11 = arith.constant 0 : index
      %c0_12 = arith.constant 0 : index
      %c0_13 = arith.constant 0 : index
      %25 = vector.load %arg5[%c0_11, %c0_12, %c0_13] : memref<1x1x512xf32, #tpu.memory_space<vmem>>, vector<1x1x512xf32>
      tpu.vector_store %arg5[%c0_11, %c0_12, %c0_13], %24 {strides = array<i32>} : memref<1x1x512xf32, #tpu.memory_space<vmem>>, vector<1x1x512xf32>,
    } else {
    }
    return
  }
  func.func @transform_0(%arg0: i32) -> (i32, i32) {
    %c0_i32 = arith.constant 0 : i32
    %c0_i32_0 = arith.constant 0 : i32
    return %arg0, %c0_i32 : i32, i32
  }
  func.func @transform_1(%arg0: i32) -> (i32, i32) {
    %c0_i32 = arith.constant 0 : i32
    %c0_i32_0 = arith.constant 0 : i32
    %c0_i32_1 = arith.constant 0 : i32
    return %c0_i32, %c0_i32_0 : i32, i32
  }
  func.func @transform_2(%arg0: i32) -> (i32, i32) {
    %c0_i32 = arith.constant 0 : i32
    %c0_i32_0 = arith.constant 0 : i32
    %c0_i32_1 = arith.constant 0 : i32
    return %c0_i32, %c0_i32_0 : i32, i32
  }
  func.func @transform_3(%arg0: i32) -> (i32, i32) {
    %c0_i32 = arith.constant 0 : i32
    %c0_i32_0 = arith.constant 0 : i32
    return %arg0, %c0_i32 : i32, i32
  }
  func.func @transform_4(%arg0: i32) -> (i32, i32, i32) {
    %c0_i32 = arith.constant 0 : i32
    %c0_i32_0 = arith.constant 0 : i32
    %c0_i32_1 = arith.constant 0 : i32
    return %arg0, %c0_i32, %c0_i32_0 : i32, i32, i32
  }
}

</mosaic_0001>

<bundles_post_ra>
// kernel: tpu_custom_call.1
= control target key start
LH: loop header
LB: loop body
LE: loop exit
PB: predicated region body
PF: predicated region fallthrough
CT: control target
= control target key end

     0   :  { %10 = vsyncpa [#allocation3], 0  ;;  %s826_s0 = inlined_call_operand.hbm [shape: f32[1,512], index: 0, kind: input, shape index: {}]   ;;  %s827_s1 = inlined_call_operand.hbm [shape: f32[1,512], index: 1, kind: input, shape index: {}]   ;;  %s828_s2 = inlined_call_operand.hbm [shape: f32[1,512], index: 2, kind: input, shape index: {}]   ;;  %s829_s3 = inlined_call_operand.hbm [shape: f32[1,512], index: 3, kind: output, shape index: {0}]   ;;  %s830_s4 = inlined_call_operand.hbm [shape: f32[1,1,512], index: 4, kind: output, shape index: {1}]  }
   0x1   :  { %11 = vsyncpa [#allocation6], 0 }
   0x2   :  { %12 = vsyncpa [#allocation4], 0 }
   0x3   :  { %13 = vsyncpa [#allocation10], 0 }
   0x4   :  { %18 = vsyncadd [#allocation3], 448  ;;  %s713_s15 = smov [#allocation5]   ;;  %s714_s17 = smov [#allocation2]  }
   0x5   :  { %s32_s16 = sshll.u32 %s713_s15, 4  ;;  %s19_s18 = sshll.u32 %s714_s17, 4  ;;  %s33_s16 = int_to_ptr.vmem [resolvable:$true] %s32_s16  ;;  %s20_s18 = int_to_ptr.vmem [resolvable:$true] %s19_s18 }
   0x6   :  { %s613_s19 = scalar_lea.vmem %s33_s16, 64  ;;  %p618_p1 = scmp.lt.s32.totalorder %s33_s16, %s33_s16 }
   0x7   :  { %p614_p0 = scmp.ne.s32.totalorder %s33_s16, %s613_s19  ;;  %p619_p2 = scmp.lt.s32.totalorder %s613_s19, %s613_s19 }
   0x9   :  { %p620_p3 = por %p619_p2, %p618_p1 }
   0xb   :  { %p621_p4 = pnand %p620_p3, %p614_p0 }
   0xd   :  { %624 = shalt.err (!%p621_p4)
}
   0xe   :  { %35 = dma.hbm_to_vmem [thread:$0]  %s827_s1, 64, %s33_s16, [#allocation6]  }
   0xf   :  { %s633_s22 = scalar_lea.vmem %s20_s18, 64  ;;  %s637_s23 = scalar_lea.vmem %s20_s18, 512 }
  0x10   :  { %p634_p5 = scmp.ne.s32.totalorder %s20_s18, %s633_s22  ;;  %p638_p6 = scmp.lt.s32.totalorder %s20_s18, %s20_s18 }
  0x11   :  { %p639_p7 = scmp.lt.s32.totalorder %s637_s23, %s633_s22 }
  0x13   :  { %p640_p8 = por %p639_p7, %p638_p6 }
  0x15   :  { %p641_p9 = pnand %p640_p8, %p634_p5 }
  0x17   :  { %644 = shalt.err (!%p641_p9)
}
  0x18   :  { %s715_s24 = smov 64   ;;  %s716_s25 = smov 4  }
  0x19   :  { %25 = dma.hbm_to_vmem [thread:$0]  %s826_s0, 64, %s20_s18, [#allocation3], %s715_s24, %s715_s24, %s716_s25  }
  0x1a   :  { %s717_s28 = smov [#allocation7]  }
  0x1b   :  { %s42_s29 = sshll.u32 %s717_s28, 4  ;;  %s43_s29 = int_to_ptr.vmem [resolvable:$true] %s42_s29 }
  0x1c   :  { %s653_s1 = scalar_lea.vmem %s43_s29, 64  ;;  %p658_p11 = scmp.lt.s32.totalorder %s43_s29, %s43_s29 }
  0x1d   :  { %p654_p10 = scmp.ne.s32.totalorder %s43_s29, %s653_s1  ;;  %p659_p12 = scmp.lt.s32.totalorder %s653_s1, %s653_s1 }
  0x1f   :  { %p660_p13 = por %p659_p12, %p658_p11 }
  0x21   :  { %p661_p0 = pnand %p660_p13, %p654_p10 }
  0x23   :  { %664 = shalt.err (!%p661_p0)
}
  0x24   :  { %45 = dma.hbm_to_vmem [thread:$0]  %s828_s2, 64, %s43_s29, [#allocation6]  }
  0x25   :  { %705 = dma.done.wait [#allocation3], 512  }
  0x26   :  { %706 = vsyncadd [#allocation3], 4294966784 }
  0x27   :  { %707 = dma.done.wait [#allocation6], 128  }
  0x28   :  { %708 = vsyncadd [#allocation6], 4294967168  ;;  %v65_v0 = vlaneseq  ;;  %v718_v1 = vmov 1966171168   ;;  %v55_v9 = vld [vmem:[#allocation2] sm:$0xf] }
  0x29   :  { %v86_v2 = vunpack.c.l.s4 %v718_v1  ;;  %v63_v10 = vld [vmem:[#allocation5] sm:$0xf]  ;;  %v165_v12 = vld [vmem:[#allocation7] sm:$0xf]  ;;  %v57_v18 = vld [vmem:[#allocation2 + $0x8] sm:$0xf] }
  0x2a   :  { %v758_v3 = vshrl.u32 %v65_v0, 7  ;;  %v56_v17 = vld [vmem:[#allocation2 + $0x4] sm:$0xf]  ;;  %v58_v19 = vld [vmem:[#allocation2 + $0xc] sm:$0xf]  ;;  %vm776_vm0 = vcmp.lt.s32.totalorder %v65_v0, 512 }
  0x2b   :  { %v87_v4 = vunpack.c.0.s8 %v86_v2  ;;  %v435_v26 = vcombine.low %v55_v9, %v56_v17  ;;  %v436_v27 = vcombine.low %v57_v18, %v58_v19  ;;  %v59_v58 = vld [vmem:[#allocation2 + $0x10] sm:$0xf]  ;;  %v60_v59 = vld [vmem:[#allocation2 + $0x14] sm:$0xf]  ;;  %v61_v0 = vld [vmem:[#allocation2 + $0x18] sm:$0xf] }
  0x2c   :  { %v67_v5 = vsub.s32 0, %v758_v3  ;;  %v71_v6 = vsub.s32 1, %v758_v3  ;;  %v75_v7 = vsub.s32 2, %v758_v3  ;;  %v79_v8 = vsub.s32 3, %v758_v3  ;;  %v62_v1 = vld [vmem:[#allocation2 + $0x1c] sm:$0xf] }
  0x2d   :  { %v765_v11 = vsub.s32 %v87_v4, %v758_v3  ;;  %vm426_vm1 = vcmp.lt.s32.totalorder %v758_v3, 1 }
  0x2e   :  { %v68_v13 = vrot.slane %v63_v10, %v67_v5  ;;  %v72_v14 = vrot.slane %v63_v10, %v71_v6  ;;  %v76_v15 = vrot.slane %v63_v10, %v75_v7  ;;  %v80_v16 = vrot.slane %v63_v10, %v79_v8 }
  0x2f   :  { %v170_v20 = vrot.slane %v165_v12, %v67_v5  ;;  %v174_v21 = vrot.slane %v165_v12, %v71_v6  ;;  %v178_v22 = vrot.slane %v165_v12, %v75_v7  ;;  %v182_v23 = vrot.slane %v165_v12, %v79_v8 }
  0x30   :  { %v81_v24 = vcombine.low %v68_v13, %v72_v14  ;;  %v83_v25 = vcombine.low %v76_v15, %v80_v16  ;;  %v82_v30 = vcombine.high %v68_v13, %v72_v14  ;;  %v84_v31 = vcombine.high %v76_v15, %v80_v16 }
  0x31   :  { %v183_v28 = vcombine.low %v170_v20, %v174_v21  ;;  %v185_v29 = vcombine.low %v178_v22, %v182_v23  ;;  %v445_v34 = vrot.slane %v435_v26, %v765_v11  ;;  %v452_v35 = vrot.slane %v436_v27, %v765_v11 }
  0x32   :  { %v91_v32 = vrot.slane %v81_v24, %v765_v11  ;;  %v105_v33 = vrot.slane %v83_v25, %v765_v11  ;;  %v98_v38 = vrot.slane %v82_v30, %v765_v11  ;;  %v112_v39 = vrot.slane %v84_v31, %v765_v11 }
  0x33   :  { %v193_v36 = vrot.slane %v183_v28, %v765_v11  ;;  %v207_v37 = vrot.slane %v185_v29, %v765_v11  ;;  %v184_v45 = vcombine.high %v170_v20, %v174_v21  ;;  %v467_v49 = vcombine.low %v445_v34, %v452_v35 }
  0x34   :  { %v113_v40 = vcombine.low %v91_v32, %v105_v33  ;;  %v114_v41 = vcombine.high %v91_v32, %v105_v33  ;;  %v115_v44 = vcombine.low %v98_v38, %v112_v39  ;;  %v186_v53 = vcombine.high %v178_v22, %v182_v23 }
  0x35   :  { %v215_v42 = vcombine.low %v193_v36, %v207_v37  ;;  %v216_v43 = vcombine.high %v193_v36, %v207_v37  ;;  %v468_v62 = vcombine.high %v445_v34, %v452_v35  ;;  %v200_v63 = vrot.slane %v184_v45, %v765_v11 }
  0x36   :  { %v123_v46 = vrot.slane %v113_v40, %v765_v11  ;;  %v137_v48 = vrot.slane %v114_v41, %v765_v11  ;;  %v130_v52 = vrot.slane %v115_v44, %v765_v11  ;;  %v214_v7 = vrot.slane %v186_v53, %v765_v11 }
  0x37   :  { %v225_v50 = vrot.slane %v215_v42, %v765_v11  ;;  %v239_v51 = vrot.slane %v216_v43, %v765_v11  ;;  %v116_v8 = vcombine.high %v98_v38, %v112_v39  ;;  %v438_v15 = vcombine.low %v61_v0, %v62_v1 }
  0x38   :  { %v157_v54 = vmul.f32 %v123_v46, %v55_v9  ;;  %v158_v55 = vmul.f32 %v137_v48, %v56_v17  ;;  %v145_v56 = vcombine.high %v123_v46, %v123_v46  ;;  %v147_v57 = vcombine.high %v137_v48, %v137_v48 }
  0x39   :  { %v247_v60 = vcombine.high %v225_v50, %v225_v50  ;;  %v249_v61 = vcombine.high %v239_v51, %v239_v51  ;;  %v437_v9 = vcombine.low %v59_v58, %v60_v59  ;;  %v146_v10 = vcombine.high %v130_v52, %v130_v52 }
  0x3a   :  { %v259_v2 = vadd.f32 %v225_v50, %v157_v54  ;;  %v260_v4 = vadd.f32 %v239_v51, %v158_v55  ;;  %v159_v5 = vmul.f32 %v145_v56, %v57_v18  ;;  %v160_v6 = vmul.f32 %v147_v57, %v58_v19 }
  0x3b   :  { %v161_v14 = vmul.f32 %v130_v52, %v59_v58  ;;  %v217_v16 = vcombine.low %v200_v63, %v214_v7  ;;  %v144_v17 = vrot.slane %v116_v8, %v765_v11  ;;  %v218_v18 = vcombine.high %v200_v63, %v214_v7 }
  0x3c   :  { %271 = vst.msk [vmem:[#allocation8] sm:$0xf] %vm776_vm0, %v259_v2  ;;  %272 = vst.msk [vmem:[#allocation8 + $0x4] sm:$0xf] %vm776_vm0, %v260_v4  ;;  %v261_v12 = vadd.f32 %v247_v60, %v159_v5  ;;  %v262_v13 = vadd.f32 %v249_v61, %v160_v6  ;;  %v459_v19 = vrot.slane %v437_v9, %v765_v11 }
  0x3d   :  { %v163_v20 = vmul.f32 %v146_v10, %v61_v0  ;;  %v466_v21 = vrot.slane %v438_v15, %v765_v11  ;;  %v232_v22 = vrot.slane %v217_v16, %v765_v11  ;;  %v162_v23 = vmul.f32 %v144_v17, %v60_v59 }
  0x3e   :  { %273 = vst.msk [vmem:[#allocation8 + $0x8] sm:$0xf] %vm776_vm0, %v261_v12  ;;  %274 = vst.msk [vmem:[#allocation8 + $0xc] sm:$0xf] %vm776_vm0, %v262_v13  ;;  %v246_v24 = vrot.slane %v218_v18, %v765_v11  ;;  %v148_v25 = vcombine.high %v144_v17, %v144_v17  ;;  %v477_v26 = vrot.slane %v467_v49, %v765_v11 }
  0x3f   :  { %v484_v27 = vrot.slane %v468_v62, %v765_v11  ;;  %v469_v28 = vcombine.low %v459_v19, %v466_v21  ;;  %v470_v29 = vcombine.high %v459_v19, %v466_v21  ;;  %v263_v30 = vadd.f32 %v232_v22, %v161_v14 }
  0x40   :  { %v264_v31 = vadd.f32 %v246_v24, %v162_v23  ;;  %v248_v32 = vcombine.high %v232_v22, %v232_v22  ;;  %v164_v33 = vmul.f32 %v148_v25, %v62_v1  ;;  %v250_v34 = vcombine.high %v246_v24, %v246_v24 }
  0x41   :  { %v491_v35 = vrot.slane %v469_v28, %v765_v11  ;;  %v498_v36 = vrot.slane %v470_v29, %v765_v11  ;;  %275 = vst.msk [vmem:[#allocation8 + $0x10] sm:$0xf] %vm776_vm0, %v263_v30 }
  0x42   :  { %276 = vst.msk [vmem:[#allocation8 + $0x14] sm:$0xf] %vm776_vm0, %v264_v31  ;;  %v265_v37 = vadd.f32 %v248_v32, %v163_v20  ;;  %v266_v38 = vadd.f32 %v250_v34, %v164_v33 }
  0x43   :  { %v499_v39 = vcombine.low %v477_v26, %v491_v35  ;;  %v500_v40 = vcombine.high %v477_v26, %v491_v35  ;;  %v501_v41 = vcombine.low %v484_v27, %v498_v36  ;;  %v502_v42 = vcombine.high %v484_v27, %v498_v36 }
  0x44   :  { %277 = vst.msk [vmem:[#allocation8 + $0x18] sm:$0xf] %vm776_vm0, %v265_v37  ;;  %278 = vst.msk [vmem:[#allocation8 + $0x1c] sm:$0xf] %vm776_vm0, %v266_v38 }
  0x45   :  { %v507_v43 = vsel %vm426_vm1, %v499_v39, 0.0  ;;  %v508_v44 = vsel %vm426_vm1, %v501_v41, 0.0  ;;  %v509_v45 = vsel %vm426_vm1, %v500_v40, 0.0  ;;  %v510_v46 = vsel %vm426_vm1, %v502_v42, 0.0 }
  0x46   :  { %v511_v48 = vrot.slane %v507_v43, 4  ;;  %v517_v49 = vrot.slane %v508_v44, 4  ;;  %v523_v50 = vrot.slane %v509_v45, 4  ;;  %v529_v51 = vrot.slane %v510_v46, 4 }
  0x48   :  { %v512_v3 = vadd.f32 %v511_v48, %v507_v43  ;;  %v518_v52 = vadd.f32 %v517_v49, %v508_v44  ;;  %v524_v53 = vadd.f32 %v523_v50, %v509_v45  ;;  %v530_v54 = vadd.f32 %v529_v51, %v510_v46 }
  0x4a   :  { %v513_v55 = vrot.slane %v512_v3, 2  ;;  %v519_v56 = vrot.slane %v518_v52, 2  ;;  %v525_v57 = vrot.slane %v524_v53, 2  ;;  %v531_v58 = vrot.slane %v530_v54, 2 }
  0x4c   :  { %v514_v59 = vadd.f32 %v513_v55, %v512_v3  ;;  %v520_v60 = vadd.f32 %v519_v56, %v518_v52  ;;  %v526_v61 = vadd.f32 %v525_v57, %v524_v53  ;;  %v532_v62 = vadd.f32 %v531_v58, %v530_v54 }
  0x4e   :  { %v515_v63 = vrot.slane %v514_v59, 1  ;;  %v521_v0 = vrot.slane %v520_v60, 1  ;;  %v527_v1 = vrot.slane %v526_v61, 1  ;;  %v533_v2 = vrot.slane %v532_v62, 1 }
  0x50   :  { %v516_v4 = vadd.f32 %v515_v63, %v514_v59  ;;  %v522_v5 = vadd.f32 %v521_v0, %v520_v60  ;;  %v528_v6 = vadd.f32 %v527_v1, %v526_v61  ;;  %v534_v7 = vadd.f32 %v533_v2, %v532_v62 }
  0x52   :  { %v539_v8 = vcombine.low %v516_v4, %v522_v5  ;;  %v540_v9 = vcombine.low %v528_v6, %v534_v7 }
  0x54   :  { %v547_v10 = vrot.slane %v539_v8, %v765_v11  ;;  %v554_v12 = vrot.slane %v540_v9, %v765_v11 }
  0x56   :  { %v555_v13 = vcombine.low %v547_v10, %v554_v12 }
  0x58   :  { %v562_v14 = vrot.slane %v555_v13, %v765_v11 }
  0x5a   :  { %564 = vst.msk [vmem:[#allocation9] sm:$0xf] %vm776_vm0, %v562_v14 }
  0x5b   :  { %569 = vsyncadd [#allocation4], 448  ;;  %s719_s0 = smov [#allocation8]   ;;  %s720_s6 = smov [#allocation9]  }
  0x5c   :  { %s570_s2 = sshll.u32 %s719_s0, 4  ;;  %s583_s7 = sshll.u32 %s720_s6, 4  ;;  %s571_s2 = int_to_ptr.vmem [resolvable:$true] %s570_s2  ;;  %s584_s7 = int_to_ptr.vmem [resolvable:$true] %s583_s7 }
  0x5d   :  { %s665_s8 = scalar_lea.vmem %s571_s2, 64  ;;  %s669_s9 = scalar_lea.vmem %s571_s2, 512 }
  0x5e   :  { %p666_p1 = scmp.ne.s32.totalorder %s571_s2, %s665_s8  ;;  %p670_p2 = scmp.lt.s32.totalorder %s571_s2, %s571_s2 }
  0x5f   :  { %p671_p3 = scmp.lt.s32.totalorder %s669_s9, %s665_s8 }
  0x61   :  { %p672_p4 = por %p671_p3, %p670_p2 }
  0x63   :  { %p673_p5 = pnand %p672_p4, %p666_p1 }
  0x65   :  { %676 = shalt.err (!%p673_p5)
}
  0x66   :  { %576 = dma.vmem_to_hbm [thread:$0]  %s571_s2, 64, %s829_s3, [#allocation4], %s715_s24, %s715_s24, %s716_s25  }
  0x67   :  { %s685_s12 = scalar_lea.vmem %s584_s7, 64  ;;  %p690_p7 = scmp.lt.s32.totalorder %s584_s7, %s584_s7 }
  0x68   :  { %p686_p6 = scmp.ne.s32.totalorder %s584_s7, %s685_s12  ;;  %p691_p8 = scmp.lt.s32.totalorder %s685_s12, %s685_s12 }
  0x6a   :  { %p692_p9 = por %p691_p8, %p690_p7 }
  0x6c   :  { %p693_p10 = pnand %p692_p9, %p686_p6 }
  0x6e   :  { %696 = shalt.err (!%p693_p10)
}
  0x6f   :  { %586 = dma.vmem_to_hbm [thread:$0]  %s584_s7, 64, %s830_s4, [#allocation10]  }
  0x70   :  { %709 = dma.done.wait [#allocation4], 512  }
  0x71   :  { %710 = vsyncadd [#allocation4], 4294966784 }
  0x72   :  { %711 = dma.done.wait [#allocation10], 64  }
  0x73   :  { %712 = vsyncadd [#allocation10], 4294967232 }
  0x74   :  { %593 = vsyncpa [#allocation3], 1 }
  0x75   :  { %594 = vsyncpa [#allocation6], 1 }
  0x76   :  { %595 = vsyncpa [#allocation4], 1 }
  0x77   :  { %596 = vsyncpa [#allocation10], 1 }

</bundles_post_ra>
